<compile_context>
chip_gen: v7x
topology: tpu7x:2x2x1
jax: 0.10.0
libtpu: 0.0.40
codegen_flags: <defaults>
</compile_context>

<pallas_src>
import jax
import jax.numpy as jnp
from jax.experimental import pallas as pl
from jax.experimental.pallas import tpu as pltpu


def _channel_att_kernel(s_ref, t_ref, x_ref, o_ref):
    # s_ref, t_ref : VMEM (tile_rows, 1)       per-row fused scale / shift (f32)
    # x_ref, o_ref : VMEM (tile_rows, tile_hw) input / output tiles (lane-dense)
    x = x_ref[...].astype(jnp.float32)
    gate = jax.nn.sigmoid(x * s_ref[...] + t_ref[...])   # broadcast over lanes
    o_ref[...] = (gate * x).astype(o_ref.dtype)


def _pick_tiles(rows8, hw_pad, itemsize, budget_bytes=2 << 20):
    """Pick (tile_rows, tile_hw): ~budget-sized, (8,128)-aligned blocks.

    budget_bytes is per (single) block; with double-buffered in+out this keeps
    resident VMEM <= ~4x budget + epsilon, well inside v5e's 16 MiB scoped
    default and v7x's 64 MiB physical VMEM.
    """
    # Lane tile: full padded HW if an 8-row slab of it fits the budget,
    # otherwise a 128-multiple chunk that does.
    max_hw = max(128, (budget_bytes // (8 * itemsize)) // 128 * 128)
    tile_hw = min(hw_pad, max_hw)
    bytes_per_row = tile_hw * itemsize
    # Row tile: largest multiple of 8 under the budget.
    tile_rows = max(8, min(rows8, (budget_bytes // bytes_per_row) // 8 * 8))
    # If the whole problem fits in a single block but there are enough rows,
    # split into >=2 steps: enables DMA/compute overlap and v7x dual-TC use.
    if tile_rows >= rows8 and tile_hw >= hw_pad and rows8 >= 16:
        tile_rows = max(8, (rows8 // 2) // 8 * 8)
    return tile_rows, tile_hw


def channel_att(x, gamma, beta, running_mean, running_var, eps=1e-5):
    """x: (B, C, H, W). gamma/beta/running_mean/running_var: (C,). -> (B, C, H, W)."""
    B, C, H, W = x.shape
    HW = H * W
    rows = B * C

    # ---- Fold eval-mode BN + |gamma| normalization into per-channel affine.
    gamma32 = gamma.astype(jnp.float32)
    beta32 = beta.astype(jnp.float32)
    mean32 = running_mean.astype(jnp.float32)
    var32 = running_var.astype(jnp.float32)
    rstd = 1.0 / jnp.sqrt(var32 + eps)
    # NOTE: matches PyTorch exactly (sum(|gamma|) == 0 would NaN there too).
    w_bn = jnp.abs(gamma32) / jnp.sum(jnp.abs(gamma32))
    s_c = w_bn * gamma32 * rstd                        # (C,)
    t_c = w_bn * (beta32 - gamma32 * mean32 * rstd)    # (C,)

    # ---- 2D, fully dense layout: rows = B*C on sublanes, HW on lanes.
    x_flat = x.reshape(rows, HW)
    s_rows = jnp.broadcast_to(s_c[None, :], (B, C)).reshape(rows, 1)
    t_rows = jnp.broadcast_to(t_c[None, :], (B, C)).reshape(rows, 1)

    hw_128 = pl.cdiv(HW, 128) * 128                    # lane-dense (no vst.msk)
    rows8 = pl.cdiv(rows, 8) * 8
    tile_rows, tile_hw = _pick_tiles(rows8, hw_128, x.dtype.itemsize)

    rows_pad = pl.cdiv(rows, tile_rows) * tile_rows
    hw_pad = pl.cdiv(HW, tile_hw) * tile_hw

    if rows_pad != rows or hw_pad != HW:
        x_flat = jnp.pad(x_flat, ((0, rows_pad - rows), (0, hw_pad - HW)))
    if rows_pad != rows:
        s_rows = jnp.pad(s_rows, ((0, rows_pad - rows), (0, 0)))
        t_rows = jnp.pad(t_rows, ((0, rows_pad - rows), (0, 0)))

    grid = (rows_pad // tile_rows, hw_pad // tile_hw)

    out = pl.pallas_call(
        _channel_att_kernel,
        out_shape=jax.ShapeDtypeStruct((rows_pad, hw_pad), x.dtype),
        grid_spec=pl.GridSpec(
            grid=grid,
            in_specs=[
                pl.BlockSpec((tile_rows, 1), lambda r, c: (r, 0)),       # s
                pl.BlockSpec((tile_rows, 1), lambda r, c: (r, 0)),       # t
                pl.BlockSpec((tile_rows, tile_hw), lambda r, c: (r, c)),  # x
            ],
            out_specs=pl.BlockSpec((tile_rows, tile_hw), lambda r, c: (r, c)),
        ),
        compiler_params=pltpu.CompilerParams(
            # Purely elementwise: both grid axes are independent -> shardable
            # across v7x's two TensorCores.
            dimension_semantics=("parallel", "parallel"),
            # Headroom above v5e's 16 MiB scoped default; still safely under
            # v7x's 64 MiB physical VMEM (blocks are ~2 MiB each).
            vmem_limit_bytes=32 << 20,
        ),
    )(s_rows, t_rows, x_flat)

    if rows_pad != rows or hw_pad != HW:
        out = out[:rows, :HW]
    return out.reshape(B, C, H, W)


def _reference(x, gamma, beta, mean, var, eps=1e-5):
    """Pure-JAX reference matching the PyTorch forward (eval-mode BN)."""
    rstd = 1.0 / jnp.sqrt(var + eps)
    xb = (x - mean[None, :, None, None]) * (gamma * rstd)[None, :, None, None] \
         + beta[None, :, None, None]
    w_bn = jnp.abs(gamma) / jnp.sum(jnp.abs(gamma))
    y = xb * w_bn[None, :, None, None]
    return jax.nn.sigmoid(y) * x


def _run_case(key, B, C, H, W):
    kx, kg, kb, km, kv = jax.random.split(key, 5)
    x = jax.random.normal(kx, (B, C, H, W), dtype=jnp.float32)
    gamma = jax.random.normal(kg, (C,), dtype=jnp.float32)
    beta = 0.1 * jax.random.normal(kb, (C,), dtype=jnp.float32)
    running_mean = 0.1 * jax.random.normal(km, (C,), dtype=jnp.float32)
    running_var = jax.random.uniform(kv, (C,), dtype=jnp.float32,
                                     minval=0.5, maxval=1.5)

    out = channel_att(x, gamma, beta, running_mean, running_var)
    out = jax.block_until_ready(out)

    ref = _reference(x, gamma, beta, running_mean, running_var)
    assert out.shape == (B, C, H, W)
    assert jnp.allclose(out, ref, atol=1e-5, rtol=1e-5)


if __name__ == "__main__":
    key = jax.random.PRNGKey(0)
    k0, k1 = jax.random.split(key)

    # Main demo shape (HW = 256, already lane-aligned; rows = 8).
    _run_case(k0, B=2, C=4, H=16, W=16)
    # Ragged shape exercising row (B*C=6) and lane (HW=49) padding paths.
    _run_case(k1, B=2, C=3, H=7, W=7)

    print("KERNEL_OK")
</pallas_src>

<mosaic_0001>
module attributes {stable_mosaic.version = 11 : i64} {
  func.func @_channel_att_kernel(%arg0: i32, %arg1: i32, %arg2: memref<8x1xf32, #tpu.memory_space<vmem>>, %arg3: memref<8x1xf32, #tpu.memory_space<vmem>>, %arg4: memref<8x256xf32, #tpu.memory_space<vmem>>, %arg5: memref<8x256xf32, #tpu.memory_space<vmem>>) attributes {dimension_semantics = [#tpu.dimension_semantics<parallel>, #tpu.dimension_semantics<parallel>], iteration_bounds = array<i64: 1, 1>, scalar_prefetch = 0 : i64, scratch_operands = 0 : i64, tpu.core_type = #tpu.core_type<tc>, window_params = [{transform_indices = @transform_0, window_bounds = array<i64: 8, 1>}, {transform_indices = @transform_1, window_bounds = array<i64: 8, 1>}, {transform_indices = @transform_2, window_bounds = array<i64: 8, 256>}, {transform_indices = @transform_3, window_bounds = array<i64: 8, 256>}]} {
    %c0 = arith.constant 0 : index
    %c0_0 = arith.constant 0 : index
    %0 = vector.load %arg4[%c0, %c0_0] : memref<8x256xf32, #tpu.memory_space<vmem>>, vector<8x256xf32>
    %c0_1 = arith.constant 0 : index
    %c0_2 = arith.constant 0 : index
    %1 = vector.load %arg2[%c0_1, %c0_2] : memref<8x1xf32, #tpu.memory_space<vmem>>, vector<8x1xf32>
    %2 = vector.broadcast %1 : vector<8x1xf32> to vector<8x256xf32>
    %3 = arith.mulf %0, %2 : vector<8x256xf32>
    %c0_3 = arith.constant 0 : index
    %c0_4 = arith.constant 0 : index
    %4 = vector.load %arg3[%c0_3, %c0_4] : memref<8x1xf32, #tpu.memory_space<vmem>>, vector<8x1xf32>
    %5 = vector.broadcast %4 : vector<8x1xf32> to vector<8x256xf32>
    %6 = arith.addf %3, %5 : vector<8x256xf32>
    %7 = arith.negf %6 : vector<8x256xf32>
    %8 = math.exp %7 : vector<8x256xf32>
    %cst = arith.constant 1.000000e+00 : f32
    %9 = vector.broadcast %cst : f32 to vector<8x256xf32>
    %10 = arith.addf %9, %8 : vector<8x256xf32>
    %11 = arith.divf %9, %10 : vector<8x256xf32>
    %12 = arith.mulf %11, %0 : vector<8x256xf32>
    %c0_5 = arith.constant 0 : index
    %c0_6 = arith.constant 0 : index
    %13 = vector.load %arg5[%c0_5, %c0_6] : memref<8x256xf32, #tpu.memory_space<vmem>>, vector<8x256xf32>
    tpu.vector_store %arg5[%c0_5, %c0_6], %12 {strides = array<i32>} : memref<8x256xf32, #tpu.memory_space<vmem>>, vector<8x256xf32>,
    return
  }
  func.func @transform_0(%arg0: i32, %arg1: i32) -> (i32, i32) {
    %c0_i32 = arith.constant 0 : i32
    %c0_i32_0 = arith.constant 0 : i32
    return %arg0, %c0_i32 : i32, i32
  }
  func.func @transform_1(%arg0: i32, %arg1: i32) -> (i32, i32) {
    %c0_i32 = arith.constant 0 : i32
    %c0_i32_0 = arith.constant 0 : i32
    return %arg0, %c0_i32 : i32, i32
  }
  func.func @transform_2(%arg0: i32, %arg1: i32) -> (i32, i32) {
    %c0_i32 = arith.constant 0 : i32
    return %arg0, %arg1 : i32, i32
  }
  func.func @transform_3(%arg0: i32, %arg1: i32) -> (i32, i32) {
    %c0_i32 = arith.constant 0 : i32
    return %arg0, %arg1 : i32, i32
  }
}

</mosaic_0001>

<bundles_post_ra>
// kernel: tpu_custom_call.1
= control target key start
LH: loop header
LB: loop body
LE: loop exit
PB: predicated region body
PF: predicated region fallthrough
CT: control target
= control target key end

     0   :  { %s146_s0 = inlined_call_operand.vmem [shape: f32[8,1], index: 0, kind: input, shape index: {}]   ;;  %s147_s1 = inlined_call_operand.vmem [shape: f32[8,1], index: 1, kind: input, shape index: {}]   ;;  %s148_s2 = inlined_call_operand.vmem [shape: f32[8,256], index: 2, kind: input, shape index: {}]   ;;  %s149_s3 = inlined_call_operand.hbm [shape: f32[8,256], index: 3, kind: output, shape index: {}]  }
   0x1   :  { %v17_v0 = vld [vmem:[%s146_s0] sm:$0xff] }
   0x2   :  { %8 = vsyncpa [#allocation3], 0  ;;  %v100_v1 = vmov 0   ;;  %v25_v2 = vld [vmem:[%s147_s1] sm:$0xff]  ;;  %v16_v5 = vld [vmem:[%s148_s2 + $0x8] sm:$0xff]  ;;  %s101_s0 = smov [#allocation2]  }
   0x3   :  { %67 = vset.pattern.permute.xlu0 %v100_v1  ;;  %v15_v4 = vld [vmem:[%s148_s2] sm:$0xff]  ;;  %s55_s1 = sshll.u32 %s101_s0, 4  ;;  %s56_s1 = int_to_ptr.vmem [resolvable:$true] %s55_s1 }
   0x4   :  { %20 = vperm.xlu0 %67, %v17_v0   ;;  %s76_s2 = scalar_lea.vmem %s56_s1, 256  ;;  %p81_p1 = scmp.lt.s32.totalorder %s56_s1, %s56_s1 }
   0x5   :  { %p77_p0 = scmp.ne.s32.totalorder %s56_s1, %s76_s2  ;;  %p82_p2 = scmp.lt.s32.totalorder %s76_s2, %s76_s2 }
   0x7   :  { %p83_p3 = por %p82_p2, %p81_p1 }
   0x8   :  { %28 = vperm.xlu0 %67, %v25_v2  }
   0x9   :  { %p84_p4 = pnand %p83_p3, %p77_p0 }
  0x83   :  { %v21_v3 = vpop.permute.xlu0 %20 }
  0x84   :  { %v23_v6 = vmul.f32 %v21_v3, %v15_v4  ;;  %v24_v7 = vmul.f32 %v21_v3, %v16_v5 }
  0x87   :  { %v29_v8 = vpop.permute.xlu0 %28 }
  0x88   :  { %v31_v9 = vadd.f32 %v29_v8, %v23_v6  ;;  %v32_v10 = vadd.f32 %v29_v8, %v24_v7 }
  0x8a   :  { %v63_v11 = vmul.f32 -1.442695, %v31_v9  ;;  %v64_v12 = vmul.f32 -1.442695, %v32_v10 }
  0x8c   :  { %68 = vpow2.f32 %v63_v11 }
  0x8d   :  { %70 = vpow2.f32 %v64_v12 }
  0x96   :  { %v69_v13 = vpop.eup %68 }
  0x97   :  { %v71_v14 = vpop.eup %70  ;;  %v39_v15 = vadd.f32 1.0, %v69_v13 }
  0x98   :  { %v40_v16 = vadd.f32 1.0, %v71_v14 }
  0x99   :  { %72 = vrcp.f32 %v39_v15 }
  0x9a   :  { %74 = vrcp.f32 %v40_v16 }
  0xa3   :  { %v73_v17 = vpop.eup %72 }
  0xa4   :  { %v75_v18 = vpop.eup %74  ;;  %v45_v19 = vmul.f32 %v73_v17, %v15_v4 }
  0xa5   :  { %v46_v20 = vmul.f32 %v75_v18, %v16_v5 }
  0xa6   :  { %47 = vst [vmem:[#allocation2] sm:$0xff] %v45_v19 }
  0xa7   :  { %48 = vst [vmem:[#allocation2 + $0x8] sm:$0xff] %v46_v20 }
  0xa8   :  { %87 = shalt.err (!%p84_p4)
}
  0xa9   :  { %s88_s22 = scalar_lea.hbm %s149_s3, 256 }
  0xaa   :  { %p89_p5 = scmp.ne.s32.totalorder %s149_s3, %s88_s22  ;;  %p92_p6 = scmp.lt.u32.totalorder %s88_s22, %s149_s3 }
  0xac   :  { %p94_p7 = pnand %p92_p6, %p89_p5 }
  0xae   :  { %97 = shalt.err (!%p94_p7)
}
  0xaf   :  { %58 = dma.vmem_to_hbm [thread:$0]  %s56_s1, 256, %s149_s3, [#allocation3]  }
  0xb0   :  { %98 = dma.done.wait [#allocation3], 256  }
  0xb1   :  { %99 = vsyncadd [#allocation3], 4294967040 }
  0xb2   :  { %62 = vsyncpa [#allocation3], 1 }

</bundles_post_ra>
